<compile_context>
chip_gen: v7x
topology: tpu7x:2x2x1
jax: 0.10.0
libtpu: 0.0.40
codegen_flags: <defaults>
</compile_context>

<pallas_src>
import jax
import jax.numpy as jnp
from jax.experimental import pallas as pl
from jax.experimental.pallas import tpu as pltpu

LN_EPS = 1e-5  # PyTorch nn.LayerNorm default


def _round_up(x, m):
    return ((x + m - 1) // m) * m


def _device_kind():
    try:
        return jax.devices()[0].device_kind.lower()
    except Exception:
        return ""


def _default_row_tile():
    kind = _device_kind()
    if "v5 lite" in kind or "v5e" in kind or "v5lite" in kind:
        return 256          # 4x128^2 MXU, smaller default scoped VMEM
    return 512               # v6e / v7x: bigger M for the 256x256 MXU


def _tpu_vmem_capacity_bytes():
    try:
        cap = int(pltpu.get_tpu_info().vmem_capacity_bytes)
        if cap > 0:
            return cap
    except Exception:
        pass
    kind = _device_kind()
    if "v7" in kind:
        return 64 * 1024 * 1024
    return 128 * 1024 * 1024


# ---------------------------------------------------------------------------
# Kernel bodies
# ---------------------------------------------------------------------------

def _tanh_ln_dense1(h, gamma_ref, beta_ref, w1_ref, b1_ref):
    """tanh -> LayerNorm (one-pass stats, f32) -> dense_1 (bf16 MXU, f32 acc)."""
    h = jnp.tanh(h)
    inv_h = 1.0 / h.shape[-1]
    mean = jnp.sum(h, axis=-1, keepdims=True) * inv_h
    m2 = jnp.sum(h * h, axis=-1, keepdims=True) * inv_h
    var = m2 - mean * mean          # safe: tanh bounds h to [-1, 1]
    h = (h - mean) * jax.lax.rsqrt(var + LN_EPS)
    h = h * gamma_ref[...] + beta_ref[...]
    return jnp.dot(h.astype(jnp.bfloat16), w1_ref[...],
                   preferred_element_type=jnp.float32) + b1_ref[...]


def _split_kernel(hs_ref, sp_ref, w0a_ref, w0b_ref, b0_ref,
                  gamma_ref, beta_ref, w1_ref, b1_ref, o_ref):
    """dense_0 as two matmuls against the two W0 slabs (Hh, Hs both large)."""
    hs = hs_ref[...].astype(jnp.bfloat16)
    sp = sp_ref[...].astype(jnp.bfloat16)
    h = jnp.dot(hs, w0a_ref[...], preferred_element_type=jnp.float32)
    h = h + jnp.dot(sp, w0b_ref[...], preferred_element_type=jnp.float32)
    h = h + b0_ref[...]
    o_ref[...] = _tanh_ln_dense1(h, gamma_ref, beta_ref, w1_ref, b1_ref).astype(o_ref.dtype)


def _make_fused_kernel(Hh):
    """dense_0 as one long-K matmul; inputs concatenated in a VMEM scratch."""
    def kernel(hs_ref, sp_ref, w0_ref, b0_ref, gamma_ref, beta_ref,
               w1_ref, b1_ref, o_ref, x_scr):
        x_scr[:, :Hh] = hs_ref[...].astype(jnp.float32)
        x_scr[:, Hh:] = sp_ref[...].astype(jnp.float32)
        h = jnp.dot(x_scr[...].astype(jnp.bfloat16), w0_ref[...],
                    preferred_element_type=jnp.float32) + b0_ref[...]
        o_ref[...] = _tanh_ln_dense1(h, gamma_ref, beta_ref, w1_ref, b1_ref).astype(o_ref.dtype)
    return kernel


# ---------------------------------------------------------------------------
# One-time parameter preparation (hoisted out of the per-call path)
# ---------------------------------------------------------------------------

def prepare_params(params, hidden_feat_dim, *, fuse_threshold=256):
    """Split/cast/pad the weights once. `hidden_feat_dim` = feature dim of
    hidden_states (the first chunk of the concat)."""
    w0, b0, gamma, beta, w1, b1 = params
    H = w0.shape[0]
    Hh = int(hidden_feat_dim)
    Hs = H - Hh
    L = w1.shape[-1]
    L_pad = _round_up(L, 128)
    fused = min(Hh, Hs) < fuse_threshold

    prep = {
        "Hh": Hh, "Hs": Hs, "H": H, "L": L, "L_pad": L_pad, "fused": fused,
        "b0": b0.reshape(1, H).astype(jnp.float32),
        "gamma": gamma.reshape(1, H).astype(jnp.float32),
        "beta": beta.reshape(1, H).astype(jnp.float32),
        "w1": jnp.pad(w1, ((0, 0), (0, L_pad - L))).astype(jnp.bfloat16),
        "b1": jnp.pad(b1, (0, L_pad - L)).reshape(1, L_pad).astype(jnp.float32),
    }
    if fused:
        prep["w0"] = w0.astype(jnp.bfloat16)                 # (H, H)
    else:
        prep["w0a"] = w0[:Hh, :].astype(jnp.bfloat16)        # (Hh, H)
        prep["w0b"] = w0[Hh:, :].astype(jnp.bfloat16)        # (Hs, H)
    return prep


# ---------------------------------------------------------------------------
# Wrapper
# ---------------------------------------------------------------------------

def pooler_end_logits(hidden_states, start_positions, prep, *, row_tile=None):
    """hidden_states: [B, S, Hh], start_positions: [B, S, Hs], Hh+Hs == hidden."""
    B, S, Hh = hidden_states.shape
    Hs = start_positions.shape[-1]
    assert Hh == prep["Hh"] and Hs == prep["Hs"]
    H, L, L_pad, fused = prep["H"], prep["L"], prep["L_pad"], prep["fused"]
    R = B * S

    hs2d = hidden_states.reshape(R, Hh)
    sp2d = start_positions.reshape(R, Hs)

    if row_tile is None:
        row_tile = _default_row_tile()

    # Row tile: at least 2 grid steps when possible (v7x megacore), sublane
    # aligned, never larger than the sublane-padded row count.
    if R <= row_tile:
        tm = max(8, _round_up(pl.cdiv(R, 2), 8))
    else:
        tm = row_tile
    tm = min(tm, _round_up(R, 8))

    cap = _tpu_vmem_capacity_bytes()
    budget = cap - cap // 8          # leave ~1/8 of physical VMEM as margin

    def footprint(tm_, wbuf):
        act = 2 * tm_ * (Hh + Hs) * 4          # double-buffered activation tiles
        outb = 2 * tm_ * L_pad * 4             # double-buffered output tile
        if fused:
            w_bytes = H * H * 2
            scr = tm_ * H * 4                  # (tm, H) f32 concat scratch
        else:
            w_bytes = (Hh + Hs) * H * 2
            scr = 0
        w_bytes += H * L_pad * 2               # W1 (bf16)
        b_bytes = (3 * H + L_pad) * 4          # b0, gamma, beta, b1
        return act + outb + (w_bytes + b_bytes) * wbuf + scr

    # Shrink the row tile if the footprint would not fit (large H / small VMEM).
    while tm > 8 and footprint(tm, 1) + (8 << 20) > budget:
        tm = max(8, _round_up(tm // 2, 8))

    grid = (pl.cdiv(R, tm),)

    def run(buffered_weights):
        wbuf = 1 if buffered_weights else 2
        limit = _round_up(footprint(tm, wbuf), 1 << 20) + (8 << 20)  # + headroom
        limit = int(min(max(limit, 16 << 20), budget))

        if buffered_weights:
            def cspec(shape):
                return pl.BlockSpec(shape, lambda i: (0, 0),
                                    pipeline_mode=pl.Buffered(1))
        else:
            def cspec(shape):
                return pl.BlockSpec(shape, lambda i: (0, 0))

        row_spec_hs = pl.BlockSpec((tm, Hh), lambda i: (i, 0))
        row_spec_sp = pl.BlockSpec((tm, Hs), lambda i: (i, 0))
        out_spec = pl.BlockSpec((tm, L_pad), lambda i: (i, 0))

        tail_specs = [cspec((1, H)),        # b0
                      cspec((1, H)),        # gamma
                      cspec((1, H)),        # beta
                      cspec((H, L_pad)),    # W1 (lane-padded)
                      cspec((1, L_pad))]    # b1 (lane-padded)
        tail_args = (prep["b0"], prep["gamma"], prep["beta"], prep["w1"], prep["b1"])

        if fused:
            kernel = _make_fused_kernel(Hh)
            in_specs = [row_spec_hs, row_spec_sp, cspec((H, H))] + tail_specs
            args = (hs2d, sp2d, prep["w0"]) + tail_args
            scratch = [pltpu.VMEM((tm, H), jnp.float32)]
        else:
            kernel = _split_kernel
            in_specs = [row_spec_hs, row_spec_sp,
                        cspec((Hh, H)), cspec((Hs, H))] + tail_specs
            args = (hs2d, sp2d, prep["w0a"], prep["w0b"]) + tail_args
            scratch = []

        flops = 2 * R * H * H + 2 * R * H * L_pad + 10 * R * H
        bytes_accessed = (R * (Hh + Hs) * 4          # activations in
                          + (H * H + H * L_pad) * 2  # bf16 weights
                          + (3 * H + L_pad) * 4      # biases / LN params
                          + R * L_pad * 4)           # output

        out = pl.pallas_call(
            kernel,
            out_shape=jax.ShapeDtypeStruct((R, L_pad), jnp.float32),
            grid_spec=pltpu.PrefetchScalarGridSpec(
                num_scalar_prefetch=0,
                grid=grid,
                in_specs=in_specs,
                out_specs=out_spec,
                scratch_shapes=scratch,
            ),
            compiler_params=pltpu.CompilerParams(
                dimension_semantics=("parallel",),
                vmem_limit_bytes=limit,
            ),
            cost_estimate=pl.CostEstimate(
                flops=flops,
                transcendentals=R * H + R,
                bytes_accessed=bytes_accessed,
            ),
        )(*args)
        return jax.block_until_ready(out)

    try:
        out2d = run(True)          # single-buffered resident weights
    except Exception:
        out2d = run(False)         # fallback: default buffering

    return out2d[:, :L].reshape(B, S, L)


# ---------------------------------------------------------------------------
# Synthetic params + pure-JAX reference
# ---------------------------------------------------------------------------

def init_params(key, hidden_size, num_labels):
    """Deterministic synthetic parameters (PyTorch Linear: y = x @ W.T + b).
    Weights stored already transposed to (in_features, out_features)."""
    k0, k1, k2, k3 = jax.random.split(key, 4)
    bound0 = 1.0 / jnp.sqrt(hidden_size)
    w0 = jax.random.uniform(k0, (hidden_size, hidden_size), jnp.float32,
                            -bound0, bound0)
    b0 = jax.random.uniform(k1, (hidden_size,), jnp.float32, -bound0, bound0)
    gamma = jnp.ones((hidden_size,), jnp.float32)
    beta = jnp.zeros((hidden_size,), jnp.float32)
    bound1 = 1.0 / jnp.sqrt(hidden_size)
    w1 = jax.random.uniform(k2, (hidden_size, num_labels), jnp.float32,
                            -bound1, bound1)
    b1 = jax.random.uniform(k3, (num_labels,), jnp.float32, -bound1, bound1)
    return (w0, b0, gamma, beta, w1, b1)


def reference(hidden_states, start_positions, params):
    """Pure-JAX reference mirroring the kernel's bf16-matmul / f32-accumulate
    numerics (tanh + LayerNorm in f32)."""
    w0, b0, gamma, beta, w1, b1 = params
    x = jnp.concatenate([hidden_states, start_positions], axis=-1)
    h = jnp.dot(x.astype(jnp.bfloat16), w0.astype(jnp.bfloat16),
                preferred_element_type=jnp.float32) + b0
    h = jnp.tanh(h)
    mean = jnp.mean(h, axis=-1, keepdims=True)
    var = jnp.mean((h - mean) ** 2, axis=-1, keepdims=True)
    h = (h - mean) * jax.lax.rsqrt(var + LN_EPS) * gamma + beta
    return jnp.dot(h.astype(jnp.bfloat16), w1.astype(jnp.bfloat16),
                   preferred_element_type=jnp.float32) + b1


if __name__ == "__main__":
    batch, seq = 2, 8
    hidden_size, num_labels = 32, 4
    half = hidden_size // 2  # hidden_states + start_positions concat to hidden_size

    key = jax.random.PRNGKey(0)
    k_hs, k_sp, k_par = jax.random.split(key, 3)
    hidden_states = jax.random.normal(k_hs, (batch, seq, half), jnp.float32)
    start_positions = jax.random.normal(k_sp, (batch, seq, half), jnp.float32)
    params = init_params(k_par, hidden_size, num_labels)

    prep = prepare_params(params, hidden_feat_dim=half)

    out = pooler_end_logits(hidden_states, start_positions, prep)
    out = jax.block_until_ready(out)

    ref = reference(hidden_states, start_positions, params)
    assert out.shape == (batch, seq, num_labels)
    assert jnp.allclose(out, ref, atol=1e-2, rtol=1e-2)

    print("KERNEL_OK")
</pallas_src>

<mosaic_0001>
module attributes {stable_mosaic.version = 11 : i64} {
  func.func @kernel(%arg0: i32, %arg1: memref<8x16xf32, #tpu.memory_space<vmem>>, %arg2: memref<8x16xf32, #tpu.memory_space<vmem>>, %arg3: memref<32x32xbf16, #tpu.memory_space<vmem>>, %arg4: memref<1x32xf32, #tpu.memory_space<vmem>>, %arg5: memref<1x32xf32, #tpu.memory_space<vmem>>, %arg6: memref<1x32xf32, #tpu.memory_space<vmem>>, %arg7: memref<32x128xbf16, #tpu.memory_space<vmem>>, %arg8: memref<1x128xf32, #tpu.memory_space<vmem>>, %arg9: memref<8x128xf32, #tpu.memory_space<vmem>>, %arg10: memref<8x32xf32, #tpu.memory_space<vmem>>) attributes {dimension_semantics = [#tpu.dimension_semantics<parallel>], iteration_bounds = array<i64: 2>, scalar_prefetch = 0 : i64, scratch_operands = 1 : i64, tpu.core_type = #tpu.core_type<tc>, window_params = [{transform_indices = @transform_0, window_bounds = array<i64: 8, 16>}, {transform_indices = @transform_1, window_bounds = array<i64: 8, 16>}, {pipeline_mode = #tpu.pipeline_mode<synchronous>, transform_indices = @transform_2, window_bounds = array<i64: 32, 32>}, {pipeline_mode = #tpu.pipeline_mode<synchronous>, transform_indices = @transform_3, window_bounds = array<i64: 1, 32>}, {pipeline_mode = #tpu.pipeline_mode<synchronous>, transform_indices = @transform_4, window_bounds = array<i64: 1, 32>}, {pipeline_mode = #tpu.pipeline_mode<synchronous>, transform_indices = @transform_5, window_bounds = array<i64: 1, 32>}, {pipeline_mode = #tpu.pipeline_mode<synchronous>, transform_indices = @transform_6, window_bounds = array<i64: 32, 128>}, {pipeline_mode = #tpu.pipeline_mode<synchronous>, transform_indices = @transform_7, window_bounds = array<i64: 1, 128>}, {transform_indices = @transform_8, window_bounds = array<i64: 8, 128>}]} {
    %c0 = arith.constant 0 : index
    %c0_0 = arith.constant 0 : index
    %0 = vector.load %arg1[%c0, %c0_0] : memref<8x16xf32, #tpu.memory_space<vmem>>, vector<8x16xf32>
    %c0_1 = arith.constant 0 : index
    %c0_2 = arith.constant 0 : index
    %1 = vector.load %arg10[%c0_1, %c0_2] : memref<8x32xf32, #tpu.memory_space<vmem>>, vector<8x16xf32>
    tpu.vector_store %arg10[%c0_1, %c0_2], %0 {strides = array<i32>} : memref<8x32xf32, #tpu.memory_space<vmem>>, vector<8x16xf32>,
    %c0_3 = arith.constant 0 : index
    %c0_4 = arith.constant 0 : index
    %2 = vector.load %arg2[%c0_3, %c0_4] : memref<8x16xf32, #tpu.memory_space<vmem>>, vector<8x16xf32>
    %c0_5 = arith.constant 0 : index
    %c16 = arith.constant 16 : index
    %3 = vector.load %arg10[%c0_5, %c16] : memref<8x32xf32, #tpu.memory_space<vmem>>, vector<8x16xf32>
    tpu.vector_store %arg10[%c0_5, %c16], %2 {strides = array<i32>} : memref<8x32xf32, #tpu.memory_space<vmem>>, vector<8x16xf32>,
    %c0_6 = arith.constant 0 : index
    %c0_7 = arith.constant 0 : index
    %4 = vector.load %arg10[%c0_6, %c0_7] : memref<8x32xf32, #tpu.memory_space<vmem>>, vector<8x32xf32>
    %5 = arith.truncf %4 : vector<8x32xf32> to vector<8x32xbf16>
    %c0_8 = arith.constant 0 : index
    %c0_9 = arith.constant 0 : index
    %6 = vector.load %arg3[%c0_8, %c0_9] : memref<32x32xbf16, #tpu.memory_space<vmem>>, vector<32x32xbf16>
    %cst = arith.constant dense<0.000000e+00> : vector<8x32xf32>
    %7 = tpu.matmul %5, %6, %cst {dimension_numbers = #tpu.dot_dimension_numbers<[1], [0], [0], [1], [0, 0, 1, 1], [], []>} : vector<8x32xbf16>, vector<32x32xbf16>, vector<8x32xf32> -> vector<8x32xf32>
    %c0_10 = arith.constant 0 : index
    %c0_11 = arith.constant 0 : index
    %8 = vector.load %arg4[%c0_10, %c0_11] : memref<1x32xf32, #tpu.memory_space<vmem>>, vector<1x32xf32>
    %9 = vector.broadcast %8 : vector<1x32xf32> to vector<8x32xf32>
    %10 = arith.addf %7, %9 : vector<8x32xf32>
    %11 = math.tanh %10 : vector<8x32xf32>
    %cst_12 = arith.constant dense<0.000000e+00> : vector<8xf32>
    %12 = vector.multi_reduction <add>, %11, %cst_12 [1] : vector<8x32xf32> to vector<8xf32>
    %13 = vector.shape_cast %12 : vector<8xf32> to vector<8x1xf32>
    %cst_13 = arith.constant 3.125000e-02 : f32
    %14 = vector.broadcast %cst_13 : f32 to vector<8x1xf32>
    %15 = arith.mulf %13, %14 : vector<8x1xf32>
    %16 = arith.mulf %11, %11 : vector<8x32xf32>
    %cst_14 = arith.constant dense<0.000000e+00> : vector<8xf32>
    %17 = vector.multi_reduction <add>, %16, %cst_14 [1] : vector<8x32xf32> to vector<8xf32>
    %18 = vector.shape_cast %17 : vector<8xf32> to vector<8x1xf32>
    %cst_15 = arith.constant 3.125000e-02 : f32
    %19 = vector.broadcast %cst_15 : f32 to vector<8x1xf32>
    %20 = arith.mulf %18, %19 : vector<8x1xf32>
    %21 = arith.mulf %15, %15 : vector<8x1xf32>
    %22 = arith.subf %20, %21 : vector<8x1xf32>
    %23 = vector.broadcast %15 : vector<8x1xf32> to vector<8x32xf32>
    %24 = arith.subf %11, %23 : vector<8x32xf32>
    %cst_16 = arith.constant 9.99999974E-6 : f32
    %25 = vector.broadcast %cst_16 : f32 to vector<8x1xf32>
    %26 = arith.addf %22, %25 : vector<8x1xf32>
    %27 = math.rsqrt %26 : vector<8x1xf32>
    %28 = vector.broadcast %27 : vector<8x1xf32> to vector<8x32xf32>
    %29 = arith.mulf %24, %28 : vector<8x32xf32>
    %c0_17 = arith.constant 0 : index
    %c0_18 = arith.constant 0 : index
    %30 = vector.load %arg5[%c0_17, %c0_18] : memref<1x32xf32, #tpu.memory_space<vmem>>, vector<1x32xf32>
    %31 = vector.broadcast %30 : vector<1x32xf32> to vector<8x32xf32>
    %32 = arith.mulf %29, %31 : vector<8x32xf32>
    %c0_19 = arith.constant 0 : index
    %c0_20 = arith.constant 0 : index
    %33 = vector.load %arg6[%c0_19, %c0_20] : memref<1x32xf32, #tpu.memory_space<vmem>>, vector<1x32xf32>
    %34 = vector.broadcast %33 : vector<1x32xf32> to vector<8x32xf32>
    %35 = arith.addf %32, %34 : vector<8x32xf32>
    %36 = arith.truncf %35 : vector<8x32xf32> to vector<8x32xbf16>
    %c0_21 = arith.constant 0 : index
    %c0_22 = arith.constant 0 : index
    %37 = vector.load %arg7[%c0_21, %c0_22] : memref<32x128xbf16, #tpu.memory_space<vmem>>, vector<32x128xbf16>
    %cst_23 = arith.constant dense<0.000000e+00> : vector<8x128xf32>
    %38 = tpu.matmul %36, %37, %cst_23 {dimension_numbers = #tpu.dot_dimension_numbers<[1], [0], [0], [1], [0, 0, 1, 1], [], []>} : vector<8x32xbf16>, vector<32x128xbf16>, vector<8x128xf32> -> vector<8x128xf32>
    %c0_24 = arith.constant 0 : index
    %c0_25 = arith.constant 0 : index
    %39 = vector.load %arg8[%c0_24, %c0_25] : memref<1x128xf32, #tpu.memory_space<vmem>>, vector<1x128xf32>
    %40 = vector.broadcast %39 : vector<1x128xf32> to vector<8x128xf32>
    %41 = arith.addf %38, %40 : vector<8x128xf32>
    %c0_26 = arith.constant 0 : index
    %c0_27 = arith.constant 0 : index
    %42 = vector.load %arg9[%c0_26, %c0_27] : memref<8x128xf32, #tpu.memory_space<vmem>>, vector<8x128xf32>
    tpu.vector_store %arg9[%c0_26, %c0_27], %41 {strides = array<i32>} : memref<8x128xf32, #tpu.memory_space<vmem>>, vector<8x128xf32>,
    return
  }
  func.func @transform_0(%arg0: i32) -> (i32, i32) {
    %c0_i32 = arith.constant 0 : i32
    %c0_i32_0 = arith.constant 0 : i32
    return %arg0, %c0_i32 : i32, i32
  }
  func.func @transform_1(%arg0: i32) -> (i32, i32) {
    %c0_i32 = arith.constant 0 : i32
    %c0_i32_0 = arith.constant 0 : i32
    return %arg0, %c0_i32 : i32, i32
  }
  func.func @transform_2(%arg0: i32) -> (i32, i32) {
    %c0_i32 = arith.constant 0 : i32
    %c0_i32_0 = arith.constant 0 : i32
    %c0_i32_1 = arith.constant 0 : i32
    return %c0_i32, %c0_i32_0 : i32, i32
  }
  func.func @transform_3(%arg0: i32) -> (i32, i32) {
    %c0_i32 = arith.constant 0 : i32
    %c0_i32_0 = arith.constant 0 : i32
    %c0_i32_1 = arith.constant 0 : i32
    return %c0_i32, %c0_i32_0 : i32, i32
  }
  func.func @transform_4(%arg0: i32) -> (i32, i32) {
    %c0_i32 = arith.constant 0 : i32
    %c0_i32_0 = arith.constant 0 : i32
    %c0_i32_1 = arith.constant 0 : i32
    return %c0_i32, %c0_i32_0 : i32, i32
  }
  func.func @transform_5(%arg0: i32) -> (i32, i32) {
    %c0_i32 = arith.constant 0 : i32
    %c0_i32_0 = arith.constant 0 : i32
    %c0_i32_1 = arith.constant 0 : i32
    return %c0_i32, %c0_i32_0 : i32, i32
  }
  func.func @transform_6(%arg0: i32) -> (i32, i32) {
    %c0_i32 = arith.constant 0 : i32
    %c0_i32_0 = arith.constant 0 : i32
    %c0_i32_1 = arith.constant 0 : i32
    return %c0_i32, %c0_i32_0 : i32, i32
  }
  func.func @transform_7(%arg0: i32) -> (i32, i32) {
    %c0_i32 = arith.constant 0 : i32
    %c0_i32_0 = arith.constant 0 : i32
    %c0_i32_1 = arith.constant 0 : i32
    return %c0_i32, %c0_i32_0 : i32, i32
  }
  func.func @transform_8(%arg0: i32) -> (i32, i32) {
    %c0_i32 = arith.constant 0 : i32
    %c0_i32_0 = arith.constant 0 : i32
    return %arg0, %c0_i32 : i32, i32
  }
}

module attributes {stable_mosaic.version = 11 : i64} {
  func.func @kernel(%arg0: i32, %arg1: memref<8x16xf32, #tpu.memory_space<vmem>>, %arg2: memref<8x16xf32, #tpu.memory_space<vmem>>, %arg3: memref<32x32xbf16, #tpu.memory_space<vmem>>, %arg4: memref<1x32xf32, #tpu.memory_space<vmem>>, %arg5: memref<1x32xf32, #tpu.memory_space<vmem>>, %arg6: memref<1x32xf32, #tpu.memory_space<vmem>>, %arg7: memref<32x128xbf16, #tpu.memory_space<vmem>>, %arg8: memref<1x128xf32, #tpu.memory_space<vmem>>, %arg9: memref<8x128xf32, #tpu.memory_space<vmem>>, %arg10: memref<8x32xf32, #tpu.memory_space<vmem>>) attributes {dimension_semantics = [#tpu.dimension_semantics<parallel>], iteration_bounds = array<i64: 2>, scalar_prefetch = 0 : i64, scratch_operands = 1 : i64, tpu.core_type = #tpu.core_type<tc>, window_params = [{transform_indices = @transform_0, window_bounds = array<i64: 8, 16>}, {transform_indices = @transform_1, window_bounds = array<i64: 8, 16>}, {pipeline_mode = #tpu.pipeline_mode<synchronous>, transform_indices = @transform_2, window_bounds = array<i64: 32, 32>}, {pipeline_mode = #tpu.pipeline_mode<synchronous>, transform_indices = @transform_3, window_bounds = array<i64: 1, 32>}, {pipeline_mode = #tpu.pipeline_mode<synchronous>, transform_indices = @transform_4, window_bounds = array<i64: 1, 32>}, {pipeline_mode = #tpu.pipeline_mode<synchronous>, transform_indices = @transform_5, window_bounds = array<i64: 1, 32>}, {pipeline_mode = #tpu.pipeline_mode<synchronous>, transform_indices = @transform_6, window_bounds = array<i64: 32, 128>}, {pipeline_mode = #tpu.pipeline_mode<synchronous>, transform_indices = @transform_7, window_bounds = array<i64: 1, 128>}, {transform_indices = @transform_8, window_bounds = array<i64: 8, 128>}]} {
    %c0 = arith.constant 0 : index
    %c0_0 = arith.constant 0 : index
    %0 = vector.load %arg1[%c0, %c0_0] : memref<8x16xf32, #tpu.memory_space<vmem>>, vector<8x16xf32>
    %c0_1 = arith.constant 0 : index
    %c0_2 = arith.constant 0 : index
    %1 = vector.load %arg10[%c0_1, %c0_2] : memref<8x32xf32, #tpu.memory_space<vmem>>, vector<8x16xf32>
    tpu.vector_store %arg10[%c0_1, %c0_2], %0 {strides = array<i32>} : memref<8x32xf32, #tpu.memory_space<vmem>>, vector<8x16xf32>,
    %c0_3 = arith.constant 0 : index
    %c0_4 = arith.constant 0 : index
    %2 = vector.load %arg2[%c0_3, %c0_4] : memref<8x16xf32, #tpu.memory_space<vmem>>, vector<8x16xf32>
    %c0_5 = arith.constant 0 : index
    %c16 = arith.constant 16 : index
    %3 = vector.load %arg10[%c0_5, %c16] : memref<8x32xf32, #tpu.memory_space<vmem>>, vector<8x16xf32>
    tpu.vector_store %arg10[%c0_5, %c16], %2 {strides = array<i32>} : memref<8x32xf32, #tpu.memory_space<vmem>>, vector<8x16xf32>,
    %c0_6 = arith.constant 0 : index
    %c0_7 = arith.constant 0 : index
    %4 = vector.load %arg10[%c0_6, %c0_7] : memref<8x32xf32, #tpu.memory_space<vmem>>, vector<8x32xf32>
    %5 = arith.truncf %4 : vector<8x32xf32> to vector<8x32xbf16>
    %c0_8 = arith.constant 0 : index
    %c0_9 = arith.constant 0 : index
    %6 = vector.load %arg3[%c0_8, %c0_9] : memref<32x32xbf16, #tpu.memory_space<vmem>>, vector<32x32xbf16>
    %cst = arith.constant dense<0.000000e+00> : vector<8x32xf32>
    %7 = tpu.matmul %5, %6, %cst {dimension_numbers = #tpu.dot_dimension_numbers<[1], [0], [0], [1], [0, 0, 1, 1], [], []>} : vector<8x32xbf16>, vector<32x32xbf16>, vector<8x32xf32> -> vector<8x32xf32>
    %c0_10 = arith.constant 0 : index
    %c0_11 = arith.constant 0 : index
    %8 = vector.load %arg4[%c0_10, %c0_11] : memref<1x32xf32, #tpu.memory_space<vmem>>, vector<1x32xf32>
    %9 = vector.broadcast %8 : vector<1x32xf32> to vector<8x32xf32>
    %10 = arith.addf %7, %9 : vector<8x32xf32>
    %11 = math.tanh %10 : vector<8x32xf32>
    %cst_12 = arith.constant dense<0.000000e+00> : vector<8xf32>
    %12 = vector.multi_reduction <add>, %11, %cst_12 [1] : vector<8x32xf32> to vector<8xf32>
    %13 = vector.shape_cast %12 : vector<8xf32> to vector<8x1xf32>
    %cst_13 = arith.constant 3.125000e-02 : f32
    %14 = vector.broadcast %cst_13 : f32 to vector<8x1xf32>
    %15 = arith.mulf %13, %14 : vector<8x1xf32>
    %16 = arith.mulf %11, %11 : vector<8x32xf32>
    %cst_14 = arith.constant dense<0.000000e+00> : vector<8xf32>
    %17 = vector.multi_reduction <add>, %16, %cst_14 [1] : vector<8x32xf32> to vector<8xf32>
    %18 = vector.shape_cast %17 : vector<8xf32> to vector<8x1xf32>
    %cst_15 = arith.constant 3.125000e-02 : f32
    %19 = vector.broadcast %cst_15 : f32 to vector<8x1xf32>
    %20 = arith.mulf %18, %19 : vector<8x1xf32>
    %21 = arith.mulf %15, %15 : vector<8x1xf32>
    %22 = arith.subf %20, %21 : vector<8x1xf32>
    %23 = vector.broadcast %15 : vector<8x1xf32> to vector<8x32xf32>
    %24 = arith.subf %11, %23 : vector<8x32xf32>
    %cst_16 = arith.constant 9.99999974E-6 : f32
    %25 = vector.broadcast %cst_16 : f32 to vector<8x1xf32>
    %26 = arith.addf %22, %25 : vector<8x1xf32>
    %27 = math.rsqrt %26 : vector<8x1xf32>
    %28 = vector.broadcast %27 : vector<8x1xf32> to vector<8x32xf32>
    %29 = arith.mulf %24, %28 : vector<8x32xf32>
    %c0_17 = arith.constant 0 : index
    %c0_18 = arith.constant 0 : index
    %30 = vector.load %arg5[%c0_17, %c0_18] : memref<1x32xf32, #tpu.memory_space<vmem>>, vector<1x32xf32>
    %31 = vector.broadcast %30 : vector<1x32xf32> to vector<8x32xf32>
    %32 = arith.mulf %29, %31 : vector<8x32xf32>
    %c0_19 = arith.constant 0 : index
    %c0_20 = arith.constant 0 : index
    %33 = vector.load %arg6[%c0_19, %c0_20] : memref<1x32xf32, #tpu.memory_space<vmem>>, vector<1x32xf32>
    %34 = vector.broadcast %33 : vector<1x32xf32> to vector<8x32xf32>
    %35 = arith.addf %32, %34 : vector<8x32xf32>
    %36 = arith.truncf %35 : vector<8x32xf32> to vector<8x32xbf16>
    %c0_21 = arith.constant 0 : index
    %c0_22 = arith.constant 0 : index
    %37 = vector.load %arg7[%c0_21, %c0_22] : memref<32x128xbf16, #tpu.memory_space<vmem>>, vector<32x128xbf16>
    %cst_23 = arith.constant dense<0.000000e+00> : vector<8x128xf32>
    %38 = tpu.matmul %36, %37, %cst_23 {dimension_numbers = #tpu.dot_dimension_numbers<[1], [0], [0], [1], [0, 0, 1, 1], [], []>} : vector<8x32xbf16>, vector<32x128xbf16>, vector<8x128xf32> -> vector<8x128xf32>
    %c0_24 = arith.constant 0 : index
    %c0_25 = arith.constant 0 : index
    %39 = vector.load %arg8[%c0_24, %c0_25] : memref<1x128xf32, #tpu.memory_space<vmem>>, vector<1x128xf32>
    %40 = vector.broadcast %39 : vector<1x128xf32> to vector<8x128xf32>
    %41 = arith.addf %38, %40 : vector<8x128xf32>
    %c0_26 = arith.constant 0 : index
    %c0_27 = arith.constant 0 : index
    %42 = vector.load %arg9[%c0_26, %c0_27] : memref<8x128xf32, #tpu.memory_space<vmem>>, vector<8x128xf32>
    tpu.vector_store %arg9[%c0_26, %c0_27], %41 {strides = array<i32>} : memref<8x128xf32, #tpu.memory_space<vmem>>, vector<8x128xf32>,
    return
  }
  func.func @transform_0(%arg0: i32) -> (i32, i32) {
    %c0_i32 = arith.constant 0 : i32
    %c0_i32_0 = arith.constant 0 : i32
    return %arg0, %c0_i32 : i32, i32
  }
  func.func @transform_1(%arg0: i32) -> (i32, i32) {
    %c0_i32 = arith.constant 0 : i32
    %c0_i32_0 = arith.constant 0 : i32
    return %arg0, %c0_i32 : i32, i32
  }
  func.func @transform_2(%arg0: i32) -> (i32, i32) {
    %c0_i32 = arith.constant 0 : i32
    %c0_i32_0 = arith.constant 0 : i32
    %c0_i32_1 = arith.constant 0 : i32
    return %c0_i32, %c0_i32_0 : i32, i32
  }
  func.func @transform_3(%arg0: i32) -> (i32, i32) {
    %c0_i32 = arith.constant 0 : i32
    %c0_i32_0 = arith.constant 0 : i32
    %c0_i32_1 = arith.constant 0 : i32
    return %c0_i32, %c0_i32_0 : i32, i32
  }
  func.func @transform_4(%arg0: i32) -> (i32, i32) {
    %c0_i32 = arith.constant 0 : i32
    %c0_i32_0 = arith.constant 0 : i32
    %c0_i32_1 = arith.constant 0 : i32
    return %c0_i32, %c0_i32_0 : i32, i32
  }
  func.func @transform_5(%arg0: i32) -> (i32, i32) {
    %c0_i32 = arith.constant 0 : i32
    %c0_i32_0 = arith.constant 0 : i32
    %c0_i32_1 = arith.constant 0 : i32
    return %c0_i32, %c0_i32_0 : i32, i32
  }
  func.func @transform_6(%arg0: i32) -> (i32, i32) {
    %c0_i32 = arith.constant 0 : i32
    %c0_i32_0 = arith.constant 0 : i32
    %c0_i32_1 = arith.constant 0 : i32
    return %c0_i32, %c0_i32_0 : i32, i32
  }
  func.func @transform_7(%arg0: i32) -> (i32, i32) {
    %c0_i32 = arith.constant 0 : i32
    %c0_i32_0 = arith.constant 0 : i32
    %c0_i32_1 = arith.constant 0 : i32
    return %c0_i32, %c0_i32_0 : i32, i32
  }
  func.func @transform_8(%arg0: i32) -> (i32, i32) {
    %c0_i32 = arith.constant 0 : i32
    %c0_i32_0 = arith.constant 0 : i32
    return %arg0, %c0_i32 : i32, i32
  }
}

</mosaic_0001>

<bundles_post_ra>
// kernel: tpu_custom_call.1
= control target key start
LH: loop header
LB: loop body
LE: loop exit
PB: predicated region body
PF: predicated region fallthrough
CT: control target
= control target key end

     0   :  { %s1267_s0 = inlined_call_operand.hbm [shape: f32[16,16], index: 0, kind: input, shape index: {}]   ;;  %s1268_s1 = inlined_call_operand.hbm [shape: f32[16,16], index: 1, kind: input, shape index: {}]   ;;  %s1269_s2 = inlined_call_operand.hbm [shape: bf16[32,32], index: 2, kind: input, shape index: {}]   ;;  %s1270_s3 = inlined_call_operand.vmem [shape: f32[1,32], index: 3, kind: input, shape index: {}]   ;;  %s1271_s4 = inlined_call_operand.vmem [shape: f32[1,32], index: 4, kind: input, shape index: {}]   ;;  %s1272_s5 = inlined_call_operand.vmem [shape: f32[1,32], index: 5, kind: input, shape index: {}]   ;;  %s1273_s6 = inlined_call_operand.vmem [shape: bf16[32,128], index: 6, kind: input, shape index: {}]   ;;  %s1274_s7 = inlined_call_operand.vmem [shape: f32[1,128], index: 7, kind: input, shape index: {}]   ;;  %s1275_s8 = inlined_call_operand.hbm [shape: f32[16,128], index: 8, kind: output, shape index: {}]  }
   0x1   :  { %1284 = sst [smem:[#allocation18_spill]] %s1269_s2 }
   0x2   :  { %13 = vsyncpa [#allocation4], 0 }
   0x3   :  { %15 = vsyncpa [#allocation4 + $0x1], 0 }
   0x4   :  { %16 = vsyncpa [#allocation7], 0 }
   0x5   :  { %18 = vsyncpa [#allocation7 + $0x1], 0 }
   0x6   :  { %19 = vsyncpa [#allocation5], 0 }
   0x7   :  { %21 = vsyncpa [#allocation5 + $0x1], 0  ;;  %s1010_s27 = smov 0   ;;  %s1012_s28 = smov 0  }
   0x8   :  { %s1014_s29 = smov 0   ;;  %s1016_s30 = smov 0  }
   0x9 LB: > { %1285 = sst [smem:[#allocation14_spill]] %s950_s29  ;;  %s1031_s9 = sadd.s32 4294967295, %s954_s30   ;;  %s954_s30 = sphi %s1016_s30, %s1305_s30   ;;  %s950_s29 = sphi %s1014_s29, %s1307_s29   ;;  %s946_s28 = sphi %s1012_s28, %s1309_s28   ;;  %s942_s27 = sphi %s1010_s27, %s1308_s27  }
   0xa   : > { %s668_s10 = sadd.s32 4294967294, %s954_s30   ;;  %p47_p0 = scmp.ne.s32.totalorder %s946_s28, %s942_s27 }
   0xb   : > { %p1276_p1 = scmp.eq.s32.totalorder %s1031_s9, 0  ;;  %p229_p3 = scmp.eq.s32.totalorder %s668_s10, 1 }
   0xc   : > { %p669_p5 = scmp.ge.s32.totalorder %s954_s30, 1  ;;  %p236_p7 = scmp.lt.s32.totalorder %s954_s30, 3 }
   0xd   : > { %p1040_p4 = por %p1276_p1, %p47_p0  ;;  %p1045_p6 = por %p229_p3, %p47_p0 }
   0xe   : > { %p1050_p8 = pnand %p669_p5, %p236_p7  ;;  %s956_s14 = smov [#allocation8]  }
   0xf   : > { %s1286_s11 = scalar_select %p1040_p4, 1, 0 }
  0x10   : > { %s1287_s12 = scalar_select %p1045_p6, 1, 0 }
  0x11   : > { %s1289_s13 = scalar_select %p1050_p8, 1, 0 }
  0x12   : > { %1288 = sst [smem:[#allocation15_spill]] %s1287_s12  ;;  %s248_s15 = sshll.u32 %s956_s14, 4  ;;  %s1054_s15 = int_to_ptr.vmem [resolvable:$true] %s248_s15 }
  0x13   : > { %p727_p9 = pneg %p1050_p8  ;;  %s1066_s17 = sadd.s32 1, %s954_s30  }
  0x14   : > { %1291 = sst [smem:[#allocation16_spill]] %s1066_s17  ;;  %s34_s18 = sadd.s32 1, %s950_s29 }
  0x15   : > { %p1061_p11 = pnand %p727_p9, %p1276_p1  ;;  %s31_s19 = ssub.s32 %s954_s30, %s1066_s17 }
  0x16   : > { %s1292_s2 = sld [smem:[#allocation18_spill]] }
  0x17   : > { %p794_p13 = pneg %p1061_p11 }
  0x1c   : > { %s792_s22 = scalar_lea.hbm %s1292_s2, 256 }
  0x1d   : > { %p793_p12 = scmp.ne.s32.totalorder %s1292_s2, %s792_s22  ;;  %p799_p5 = scmp.lt.u32.totalorder %s792_s22, %s1292_s2 }
  0x1f   : > { %p795_p0 = pnand %p794_p13, %p793_p12 }
  0x21   : > { %p796_p3 = pneg %p795_p0 }
  0x23   : > { %p801_p7 = pnand %p799_p5, %p796_p3 }
  0x25   : > { %804 = shalt.err (!%p801_p7)
}
  0x26   : > { %s805_s10 = scalar_lea.vmem %s1054_s15, 256  ;;  %p813_p2 = scmp.lt.s32.totalorder %s1054_s15, %s1054_s15 }
  0x27   : > { %p806_p9 = scmp.ne.s32.totalorder %s1054_s15, %s805_s10  ;;  %p814_p6 = scmp.lt.s32.totalorder %s805_s10, %s805_s10 }
  0x29   : > { %p808_p10 = pnand %p806_p9, %p794_p13  ;;  %p815_p4 = por %p814_p6, %p813_p2 }
  0x2b   : > { %p809_p1 = pneg %p808_p10 }
  0x2d   : > { %p816_p8 = pnand %p815_p4, %p809_p1 }
  0x2f   : > { %819 = shalt.err (!%p816_p8)
}
  0x30   : > { %s957_s14 = smov 64   ;;  %s958_s20 = smov 4  }
  0x31   : > { %730 = dma.hbm_to_vmem [thread:$0]  (!%p1061_p11), %s1292_s2, 256, %s1054_s15, [#allocation7], %s957_s14, %s957_s14, %s958_s20  }
  0x32   : > { %p32_p2 = scmp.eq.s32.totalorder %s31_s19, 0  ;;  %p41_p1 = scmp.ne.s32.totalorder %s950_s29, %s946_s28 }
  0x33   : > { %p42_p4 = scmp.eq.s32.totalorder %s954_s30, 0  ;;  %p743_p6 = scmp.lt.s32.totalorder %s954_s30, 2 }
  0x34   : > { %s1097_s23 = scalar_select %p32_p2, %s950_s29, %s34_s18  }
  0x35   : > { %p43_p8 = por %p42_p4, %p41_p1  ;;  %p1294_p10 = scmp.eq.s32.totalorder %s1031_s9, 1 }
  0x36   : > { %1293 = sst [smem:[#allocation17_spill]] %s1097_s23  ;;  %s277_s25 = sand.u32 1, %s950_s29  }
  0x37   : > { %p1101_p12 = por %p1294_p10, %p41_p1  ;;  %s673_s26 = sshll.u32 %s954_s30, 7 }
  0x38   : > { %s1107_s10 = sshll.u32 %s277_s25, 3  ;;  %s1112_s15 = scalar_lea.hbm %s1267_s0, %s673_s26 }
  0x39   : > { %s1295_s24 = scalar_select %p1101_p12, 1, 0 }
  0x3a   : > { %s281_s18 = scalar_lea.vmem [#allocation3], %s1107_s10  ;;  %p1115_p11 = pnand %p743_p6, %p43_p8 }
  0x3b   : > { %s288_s19 = sshll.u32 %s281_s18, 4  ;;  %s1124_s17 = scalar_lea.hbm %s1268_s1, %s673_s26  ;;  %s1119_s19 = int_to_ptr.vmem [resolvable:$true] %s288_s19 }
  0x3c   : > { %s278_s22 = scalar_lea.sflag [#allocation4], %s277_s25  ;;  %s820_s16 = scalar_lea.hbm %s1112_s15, 128 }
  0x3d   : > { %p821_p13 = scmp.ne.s32.totalorder %s1112_s15, %s820_s16  ;;  %p822_p0 = pneg %p1115_p11 }
  0x3e   : > { %s825_s23 = scalar_lea.hbm %s1267_s0, 256  ;;  %p826_p7 = scmp.lt.u32.totalorder %s1112_s15, %s1267_s0 }
  0x3f   : > { %p823_p3 = pnand %p822_p0, %p821_p13  ;;  %p827_p9 = scmp.lt.u32.totalorder %s825_s23, %s820_s16 }
  0x40   : > { %p829_p1 = scmp.lt.u32.totalorder %s820_s16, %s1112_s15 }
  0x41   : > { %p824_p5 = pneg %p823_p3  ;;  %p828_p2 = por %p827_p9, %p826_p7 }
  0x43   : > { %p830_p4 = por %p829_p1, %p828_p2 }
  0x45   : > { %p831_p6 = pnand %p830_p4, %p824_p5 }
  0x47   : > { %834 = shalt.err (!%p831_p6)
}
  0x48   : > { %s835_s25 = scalar_lea.vmem %s1119_s19, 128  ;;  %s959_s2 = smov [#allocation3]  }
  0x49   : > { %p836_p8 = scmp.ne.s32.totalorder %s1119_s19, %s835_s25  ;;  %s840_s26 = sshll.u32 %s959_s2, 4  ;;  %s841_s26 = int_to_ptr.vmem [resolvable:$false] %s840_s26 }
  0x4a   : > { %s842_s29 = scalar_lea.vmem %s841_s26, 256  ;;  %p843_p3 = scmp.lt.s32.totalorder %s1119_s19, %s841_s26 }
  0x4b   : > { %p838_p10 = pnand %p836_p8, %p822_p0  ;;  %p844_p7 = scmp.lt.s32.totalorder %s842_s29, %s835_s25 }
  0x4d   : > { %p839_p13 = pneg %p838_p10  ;;  %p845_p9 = por %p844_p7, %p843_p3 }
  0x4f   : > { %p846_p2 = pnand %p845_p9, %p839_p13 }
  0x51   : > { %849 = shalt.err (!%p846_p2)
}
  0x52   : > { %734 = dma.hbm_to_vmem [thread:$0]  (!%p1115_p11), %s1112_s15, 128, %s1119_s19, %s278_s22  }
  0x53   : > { %s295_s12 = sand.u32 1, %s954_s30   ;;  %s299_s23 = scalar_lea.vmem [#allocation6], %s1107_s10 }
  0x54   : > { %s306_s20 = sshll.u32 %s299_s23, 4  ;;  %s296_s21 = scalar_lea.sflag [#allocation7], %s295_s12  ;;  %s307_s20 = int_to_ptr.vmem [resolvable:$true] %s306_s20 }
  0x55   : > { %s850_s16 = scalar_lea.hbm %s1124_s17, 128  ;;  %s855_s2 = scalar_lea.hbm %s1268_s1, 256 }
  0x56   : > { %p851_p5 = scmp.ne.s32.totalorder %s1124_s17, %s850_s16  ;;  %p856_p6 = scmp.lt.u32.totalorder %s1124_s17, %s1268_s1 }
  0x57   : > { %p857_p8 = scmp.lt.u32.totalorder %s855_s2, %s850_s16  ;;  %p859_p13 = scmp.lt.u32.totalorder %s850_s16, %s1124_s17 }
  0x58   : > { %p853_p1 = pnand %p851_p5, %p822_p0 }
  0x59   : > { %p858_p10 = por %p857_p8, %p856_p6 }
  0x5a   : > { %p854_p4 = pneg %p853_p1 }
  0x5b   : > { %p860_p3 = por %p859_p13, %p858_p10 }
  0x5d   : > { %p861_p7 = pnand %p860_p3, %p854_p4 }
  0x5f   : > { %864 = shalt.err (!%p861_p7)
}
  0x60   : > { %s865_s10 = scalar_lea.vmem %s307_s20, 128  ;;  %s960_s15 = smov [#allocation6]  }
  0x61   : > { %p866_p9 = scmp.ne.s32.totalorder %s307_s20, %s865_s10  ;;  %s870_s19 = sshll.u32 %s960_s15, 4  ;;  %s871_s19 = int_to_ptr.vmem [resolvable:$false] %s870_s19 }
  0x62   : > { %s872_s22 = scalar_lea.vmem %s871_s19, 256  ;;  %p873_p1 = scmp.lt.s32.totalorder %s307_s20, %s871_s19 }
  0x63   : > { %p868_p2 = pnand %p866_p9, %p822_p0  ;;  %p874_p12 = scmp.lt.s32.totalorder %s872_s22, %s865_s10 }
  0x65   : > { %p869_p5 = pneg %p868_p2  ;;  %p875_p6 = por %p874_p12, %p873_p1 }
  0x67   : > { %p876_p8 = pnand %p875_p6, %p869_p5 }
  0x69   : > { %879 = shalt.err (!%p876_p8)
}
  0x6a   : > { %737 = dma.hbm_to_vmem [thread:$0]  (!%p1115_p11), %s1124_s17, 128, %s307_s20, %s296_s21  }
  0x6b   : > { %p1297_p4 = scmp.ne.s32.totalorder %s1289_s13, 0 }
  0x6c   : > { %s1175_s12 = sand.u32 (!%p1297_p4), 1, %s946_s28   ;;  %p1298_p12 = scmp.ne.s32.totalorder (!%p1297_p4), %s1286_s11, 0 }
  0x6d   : > { %315 = sbr.rel (%p1297_p4) target bundleno = 874 (0x36a), region = 52  ;;  %s1178_s23 = sshll.u32 (!%p1297_p4), %s1175_s12, 3 }
  0x6e   : > { %s318_s16 = scalar_lea.sflag (!%p1297_p4), [#allocation4], %s1175_s12  ;;  %s321_s18 = scalar_lea.vmem (!%p1297_p4), [#allocation3], %s1178_s23 }
  0x74   : > { %925 = dma.done.wait (%p1298_p12), %s318_s16, 128  }
  0x75   : > { %927 = vsyncadd (%p1298_p12), %s318_s16, 4294967168  ;;  %s326_s13 = sand.u32 1, %s1031_s9   ;;  %s330_s17 = scalar_lea.vmem [#allocation6], %s1178_s23 }
  0x76   : > { %s327_s14 = scalar_lea.sflag [#allocation7], %s326_s13 }
  0x77   : > { %929 = dma.done.wait (%p1298_p12), %s327_s14, 128  }
  0x78   : > { %931 = vsyncadd (%p1298_p12), %s327_s14, 4294967168  ;;  %p1299_p11 = scmp.eq.s32.totalorder %s1031_s9, 0 }
  0x7a   : > { %933 = dma.done.wait (%p1299_p11), [#allocation7], 256   ;;  %p1300_p0 = pmov %p1299_p11 }
  0x7b   : > { %v961_v0 = vmov 0.0   ;;  %vm962_vm0 = vmmov 0   ;;  %vm374_vm1 = vcmask 130048   ;;  %v376_v1 = vld [vmem:[%s330_s17] sm:$0xff]  ;;  %v373_v2 = vld [vmem:[%s321_s18] sm:$0xff]  ;;  %s963_s20 = smov 16  }
  0x7c   : > { %935 = vsyncadd (%p1300_p0), [#allocation7], 4294967040  ;;  %701 = vmatprep.subr.bf16.mxu0 %v961_v0  ;;  %709 = vmatprep.subr.bf16.mxu1 %v961_v0  ;;  %375 = vst.msk [vmem:[#allocation2] sm:$0xff] %vm374_vm1, %v373_v2  ;;  %v784_v3 = vld [vmem:[#allocation8] sm:$0xff]   ;;  %v785_v4 = vld [vmem:[#allocation8 + $0x8] sm:$0xff]   ;;  %vm381_vm2 = vcmask 261248  }
  0x7d   : > { %705 = vmatprep.mubr.msk.bf16.mxu0 %vm962_vm0, %v961_v0  ;;  %713 = vmatprep.mubr.msk.bf16.mxu1 %vm962_vm0, %v961_v0  ;;  %vm408_vm3 = vcmask 261120   ;;  %v681_v8 = vld [vmem:[%s1270_s3] ss:$0 sm:$0xff]  ;;  %v787_v19 = vld [vmem:[%s1273_s6 + $0x8] sm:$0xff]   ;;  %s692_s13 = sshll.u32 %s1031_s9, 7  ;;  %s371_s14 = scalar_lea.vmem [#allocation9], %s1178_s23 }
  0x7e   : > { %378 = vrot.lane.b32.xlu0 %v376_v1, %s963_s20  ;;  %702 = vmatpush3.bf16.msra.mxu0 %v784_v3  ;;  %v786_v18 = vld [vmem:[%s1273_s6] sm:$0xff]   ;;  %s566_s17 = sshll.u32 %s371_s14, 4  ;;  %s1223_s21 = scalar_lea.hbm %s1275_s8, %s692_s13  ;;  %s1225_s17 = int_to_ptr.vmem [resolvable:$true] %s566_s17 }
  0x7f   : > { %703 = vmatprep.subr.bf16.mxu0 %v961_v0  ;;  %710 = vmatpush3.bf16.msra.mxu1 %v786_v18  ;;  %v685_v29 = vld [vmem:[%s1271_s4] ss:$0 sm:$0xff]  ;;  %s553_s25 = scalar_lea.sflag [#allocation5], %s1175_s12  ;;  %s880_s9 = scalar_lea.vmem %s1225_s17, 128 }
  0x80   : > { %711 = vmatprep.subr.bf16.mxu1 %v961_v0  ;;  %v686_v31 = vld [vmem:[%s1272_s5] ss:$0 sm:$0xff]  ;;  %p881_p10 = scmp.ne.s32.totalorder %s1225_s17, %s880_s9  ;;  %p1301_p13 = scmp.ne.s32.totalorder %s1295_s24, 0 }
  0x81   : > { %v687_v35 = vld [vmem:[%s1274_s7] ss:$0 sm:$0xff]  ;;  %s964_s23 = smov [#allocation9]  }
  0x82   : > { %704 = vmatpush3.bf16.msra.mxu0 %v785_v4  ;;  %p882_p3 = pnand %p881_p10, %p1301_p13  ;;  %s884_s2 = sshll.u32 %s964_s23, 4  ;;  %s885_s2 = int_to_ptr.vmem [resolvable:$false] %s884_s2 }
  0x83   : > { %712 = vmatpush3.bf16.msra.mxu1 %v787_v19  ;;  %s886_s26 = scalar_lea.vmem %s885_s2, 256  ;;  %p887_p9 = scmp.lt.s32.totalorder %s1225_s17, %s885_s2 }
  0x84   : > { %p883_p7 = pneg %p882_p3  ;;  %p888_p2 = scmp.lt.s32.totalorder %s886_s26, %s880_s9 }
  0x86   : > { %p889_p5 = por %p888_p2, %p887_p9 }
  0x88   : > { %p890_p1 = pnand %p889_p5, %p883_p7 }
  0xf0   : > { %v379_v5 = vpop.permute.xlu0 %378 }
  0xf1   : > { %382 = vst.msk [vmem:[#allocation2] sm:$0xff] %vm381_vm2, %v379_v5 }
  0xf8   : > { %v383_v6 = vld [vmem:[#allocation2] sm:$0xff] }
  0xf9   : > { %v384_v7 = vpack.c.bf16 %v383_v6, %v383_v6 }
  0xfb   : > { %706 = vmatmul.mubr.msk.bf16.vlgmr.msra.gmra.mrb[0].mxu0 %vm408_vm3, %v384_v7 }
 0x1ce   : > { %v446_v9 = vpop.f32.mrb[0].mxu0 }
 0x1cf   : > { %v447_v10 = vadd.f32 %v681_v8, %v446_v9  ;;  %v707_v11 = vpop.f32.mrb[1].mxu0 }
 0x1d0   : > { %v449_v12 = vpop.f32.mrb[2].mxu0 }
 0x1d1   : > { %788 = vtanh.f32 %v447_v10  ;;  %v708_v13 = vpop.f32.mrb[3].mxu0 }
 0x1db   : > { %v789_v14 = vpop.eup %788 }
 0x1dc   : > { %v453_v15 = vsel %vm408_vm3, %v789_v14, 0.0  ;;  %v457_v16 = vmul.f32 %v789_v14, %v789_v14 }
 0x1dd   : > { %454 = vadd.xlane.f32.xlu0 %v453_v15 }
 0x1de   : > { %v458_v17 = vsel %vm408_vm3, %v457_v16, 0.0 }
 0x1df   : > { %459 = vadd.xlane.f32.xlu1 %v458_v17 }
 0x26a   : > { %v455_v20 = vpop.xlane.xlu0 %454 }
 0x26b   : > { %v456_v21 = vmul.f32 0.03125, %v455_v20 }
 0x26c   : > { %v460_v22 = vpop.xlane.xlu1 %459 }
 0x26d   : > { %v462_v23 = vmul.f32 %v456_v21, %v456_v21  ;;  %v461_v24 = vmul.f32 0.03125, %v460_v22  ;;  %v464_v27 = vsub.f32 %v789_v14, %v456_v21 }
 0x26f   : > { %v463_v25 = vsub.f32 %v461_v24, %v462_v23 }
 0x271   : > { %v465_v26 = vadd.f32 1e-05, %v463_v25 }
 0x273   : > { %790 = vrsqrt.f32 %v465_v26 }
 0x27d   : > { %v791_v28 = vpop.eup %790 }
 0x27e   : > { %v467_v30 = vmul.f32 %v791_v28, %v464_v27 }
 0x280   : > { %v475_v32 = vmul.f32 %v685_v29, %v467_v30 }
 0x282   : > { %v483_v33 = vadd.f32 %v686_v31, %v475_v32 }
 0x284   : > { %v484_v34 = vpack.c.bf16 %v483_v33, %v483_v33 }
 0x286   : > { %714 = vmatmul.mubr.msk.bf16.vlgmr.msra.gmra.mrb[0].mxu1 %vm408_vm3, %v484_v34 }
 0x359   : > { %v545_v36 = vpop.f32.mrb[0].mxu1 }
 0x35a   : > { %v546_v37 = vadd.f32 %v687_v35, %v545_v36  ;;  %v715_v38 = vpop.f32.mrb[1].mxu1 }
 0x35b   : > { %v548_v39 = vpop.f32.mrb[2].mxu1 }
 0x35c   : > { %551 = vst [vmem:[%s371_s14] sm:$0xff] %v546_v37  ;;  %v716_v40 = vpop.f32.mrb[3].mxu1 }
 0x35d   : > { %893 = shalt.err (!%p890_p1)
}
 0x35e   : > { %s894_s12 = scalar_lea.hbm %s1223_s21, 128  ;;  %s898_s15 = scalar_lea.hbm %s1275_s8, 256 }
 0x35f   : > { %p895_p6 = scmp.ne.s32.totalorder %s1223_s21, %s894_s12  ;;  %p899_p12 = scmp.lt.u32.totalorder %s1223_s21, %s1275_s8 }
 0x360   : > { %p900_p11 = scmp.lt.u32.totalorder %s898_s15, %s894_s12  ;;  %p902_p10 = scmp.lt.u32.totalorder %s894_s12, %s1223_s21 }
 0x361   : > { %p896_p8 = pnand %p895_p6, %p1301_p13 }
 0x362   : > { %p901_p0 = por %p900_p11, %p899_p12 }
 0x363   : > { %p897_p4 = pneg %p896_p8 }
 0x364   : > { %p903_p3 = por %p902_p10, %p901_p0 }
 0x366   : > { %p904_p7 = pnand %p903_p3, %p897_p4 }
 0x368   : > { %907 = shalt.err (!%p904_p7)
}
 0x369   : > { %725 = dma.vmem_to_hbm [thread:$0]  (%p1301_p13), %s1225_s17, 128, %s1223_s21, %s553_s25  }
 0x36a PF: > { %s1302_s16 = sld [smem:[#allocation15_spill]]  ;;  %s578_s18 = sand.u32 1, %s942_s27  }
 0x36b   : > { %p1304_p2 = scmp.ge.s32.totalorder %s954_s30, 2  ;;  %s579_s13 = scalar_lea.sflag [#allocation5], %s578_s18 }
 0x370   : > { %p1303_p9 = scmp.ne.s32.totalorder %s1302_s16, 0 }
 0x372   : > { %p739_p5 = pnand %p1304_p2, %p1303_p9 }
 0x374   : > { %937 = dma.done.wait (!%p739_p5), %s579_s13, 128  }
 0x375   : > { %939 = vsyncadd (!%p739_p5), %s579_s13, 4294967168  ;;  %s1305_s30 = sld [smem:[#allocation16_spill]]  ;;  %s1306_s14 = sld [smem:[#allocation14_spill]] }
 0x376   : > { %s1307_s29 = sld [smem:[#allocation17_spill]]  ;;  %s1308_s27 = smov %s946_s28 }
 0x37b   : > { %p24_p1 = scmp.ge.s32.totalorder %s1305_s30, 4   ;;  %s1309_s28 = smov %s1306_s14 }
 0x37d   :  { %26 = sbr.rel (!%p24_p1) target bundleno = 9 (0x9), region = 114 }
 0x384   :  { %584 = vsyncpa [#allocation4], 1 }
 0x385   :  { %586 = vsyncpa [#allocation4 + $0x1], 1 }
 0x386   :  { %587 = vsyncpa [#allocation7], 1 }
 0x387   :  { %589 = vsyncpa [#allocation7 + $0x1], 1 }
 0x388   :  { %590 = vsyncpa [#allocation5], 1 }
 0x389   :  { %592 = vsyncpa [#allocation5 + $0x1], 1 }

// kernel: tpu_custom_call.1
= control target key start
LH: loop header
LB: loop body
LE: loop exit
PB: predicated region body
PF: predicated region fallthrough
CT: control target
= control target key end

     0   :  { %s1267_s0 = inlined_call_operand.hbm [shape: f32[16,16], index: 0, kind: input, shape index: {}]   ;;  %s1268_s1 = inlined_call_operand.hbm [shape: f32[16,16], index: 1, kind: input, shape index: {}]   ;;  %s1269_s2 = inlined_call_operand.hbm [shape: bf16[32,32], index: 2, kind: input, shape index: {}]   ;;  %s1270_s3 = inlined_call_operand.vmem [shape: f32[1,32], index: 3, kind: input, shape index: {}]   ;;  %s1271_s4 = inlined_call_operand.vmem [shape: f32[1,32], index: 4, kind: input, shape index: {}]   ;;  %s1272_s5 = inlined_call_operand.vmem [shape: f32[1,32], index: 5, kind: input, shape index: {}]   ;;  %s1273_s6 = inlined_call_operand.vmem [shape: bf16[32,128], index: 6, kind: input, shape index: {}]   ;;  %s1274_s7 = inlined_call_operand.vmem [shape: f32[1,128], index: 7, kind: input, shape index: {}]   ;;  %s1275_s8 = inlined_call_operand.hbm [shape: f32[16,128], index: 8, kind: output, shape index: {}]  }
   0x1   :  { %1284 = sst [smem:[#allocation18_spill]] %s1269_s2 }
   0x2   :  { %13 = vsyncpa [#allocation4], 0 }
   0x3   :  { %15 = vsyncpa [#allocation4 + $0x1], 0 }
   0x4   :  { %16 = vsyncpa [#allocation7], 0 }
   0x5   :  { %18 = vsyncpa [#allocation7 + $0x1], 0 }
   0x6   :  { %19 = vsyncpa [#allocation5], 0 }
   0x7   :  { %21 = vsyncpa [#allocation5 + $0x1], 0  ;;  %s1010_s27 = smov 0   ;;  %s1012_s28 = smov 0  }
   0x8   :  { %s1014_s29 = smov 0   ;;  %s1016_s30 = smov 0  }
   0x9 LB: > { %1285 = sst [smem:[#allocation14_spill]] %s950_s29  ;;  %s1031_s9 = sadd.s32 4294967295, %s954_s30   ;;  %s954_s30 = sphi %s1016_s30, %s1305_s30   ;;  %s950_s29 = sphi %s1014_s29, %s1307_s29   ;;  %s946_s28 = sphi %s1012_s28, %s1309_s28   ;;  %s942_s27 = sphi %s1010_s27, %s1308_s27  }
   0xa   : > { %s668_s10 = sadd.s32 4294967294, %s954_s30   ;;  %p47_p0 = scmp.ne.s32.totalorder %s946_s28, %s942_s27 }
   0xb   : > { %p1276_p1 = scmp.eq.s32.totalorder %s1031_s9, 0  ;;  %p229_p3 = scmp.eq.s32.totalorder %s668_s10, 1 }
   0xc   : > { %p669_p5 = scmp.ge.s32.totalorder %s954_s30, 1  ;;  %p236_p7 = scmp.lt.s32.totalorder %s954_s30, 3 }
   0xd   : > { %p1040_p4 = por %p1276_p1, %p47_p0  ;;  %p1045_p6 = por %p229_p3, %p47_p0 }
   0xe   : > { %p1050_p8 = pnand %p669_p5, %p236_p7  ;;  %s956_s14 = smov [#allocation8]  }
   0xf   : > { %s1286_s11 = scalar_select %p1040_p4, 1, 0 }
  0x10   : > { %s1287_s12 = scalar_select %p1045_p6, 1, 0 }
  0x11   : > { %s1289_s13 = scalar_select %p1050_p8, 1, 0 }
  0x12   : > { %1288 = sst [smem:[#allocation15_spill]] %s1287_s12  ;;  %s248_s15 = sshll.u32 %s956_s14, 4  ;;  %s1054_s15 = int_to_ptr.vmem [resolvable:$true] %s248_s15 }
  0x13   : > { %p727_p9 = pneg %p1050_p8  ;;  %s1066_s17 = sadd.s32 1, %s954_s30  }
  0x14   : > { %1291 = sst [smem:[#allocation16_spill]] %s1066_s17  ;;  %s34_s18 = sadd.s32 1, %s950_s29 }
  0x15   : > { %p1061_p11 = pnand %p727_p9, %p1276_p1  ;;  %s31_s19 = ssub.s32 %s954_s30, %s1066_s17 }
  0x16   : > { %s1292_s2 = sld [smem:[#allocation18_spill]] }
  0x17   : > { %p794_p13 = pneg %p1061_p11 }
  0x1c   : > { %s792_s22 = scalar_lea.hbm %s1292_s2, 256 }
  0x1d   : > { %p793_p12 = scmp.ne.s32.totalorder %s1292_s2, %s792_s22  ;;  %p799_p5 = scmp.lt.u32.totalorder %s792_s22, %s1292_s2 }
  0x1f   : > { %p795_p0 = pnand %p794_p13, %p793_p12 }
  0x21   : > { %p796_p3 = pneg %p795_p0 }
  0x23   : > { %p801_p7 = pnand %p799_p5, %p796_p3 }
  0x25   : > { %804 = shalt.err (!%p801_p7)
}
  0x26   : > { %s805_s10 = scalar_lea.vmem %s1054_s15, 256  ;;  %p813_p2 = scmp.lt.s32.totalorder %s1054_s15, %s1054_s15 }
  0x27   : > { %p806_p9 = scmp.ne.s32.totalorder %s1054_s15, %s805_s10  ;;  %p814_p6 = scmp.lt.s32.totalorder %s805_s10, %s805_s10 }
  0x29   : > { %p808_p10 = pnand %p806_p9, %p794_p13  ;;  %p815_p4 = por %p814_p6, %p813_p2 }
  0x2b   : > { %p809_p1 = pneg %p808_p10 }
  0x2d   : > { %p816_p8 = pnand %p815_p4, %p809_p1 }
  0x2f   : > { %819 = shalt.err (!%p816_p8)
}
  0x30   : > { %s957_s14 = smov 64   ;;  %s958_s20 = smov 4  }
  0x31   : > { %730 = dma.hbm_to_vmem [thread:$0]  (!%p1061_p11), %s1292_s2, 256, %s1054_s15, [#allocation7], %s957_s14, %s957_s14, %s958_s20  }
  0x32   : > { %p32_p2 = scmp.eq.s32.totalorder %s31_s19, 0  ;;  %p41_p1 = scmp.ne.s32.totalorder %s950_s29, %s946_s28 }
  0x33   : > { %p42_p4 = scmp.eq.s32.totalorder %s954_s30, 0  ;;  %p743_p6 = scmp.lt.s32.totalorder %s954_s30, 2 }
  0x34   : > { %s1097_s23 = scalar_select %p32_p2, %s950_s29, %s34_s18  }
  0x35   : > { %p43_p8 = por %p42_p4, %p41_p1  ;;  %p1294_p10 = scmp.eq.s32.totalorder %s1031_s9, 1 }
  0x36   : > { %1293 = sst [smem:[#allocation17_spill]] %s1097_s23  ;;  %s277_s25 = sand.u32 1, %s950_s29  }
  0x37   : > { %p1101_p12 = por %p1294_p10, %p41_p1  ;;  %s673_s26 = sshll.u32 %s954_s30, 7 }
  0x38   : > { %s1107_s10 = sshll.u32 %s277_s25, 3  ;;  %s1112_s15 = scalar_lea.hbm %s1267_s0, %s673_s26 }
  0x39   : > { %s1295_s24 = scalar_select %p1101_p12, 1, 0 }
  0x3a   : > { %s281_s18 = scalar_lea.vmem [#allocation3], %s1107_s10  ;;  %p1115_p11 = pnand %p743_p6, %p43_p8 }
  0x3b   : > { %s288_s19 = sshll.u32 %s281_s18, 4  ;;  %s1124_s17 = scalar_lea.hbm %s1268_s1, %s673_s26  ;;  %s1119_s19 = int_to_ptr.vmem [resolvable:$true] %s288_s19 }
  0x3c   : > { %s278_s22 = scalar_lea.sflag [#allocation4], %s277_s25  ;;  %s820_s16 = scalar_lea.hbm %s1112_s15, 128 }
  0x3d   : > { %p821_p13 = scmp.ne.s32.totalorder %s1112_s15, %s820_s16  ;;  %p822_p0 = pneg %p1115_p11 }
  0x3e   : > { %s825_s23 = scalar_lea.hbm %s1267_s0, 256  ;;  %p826_p7 = scmp.lt.u32.totalorder %s1112_s15, %s1267_s0 }
  0x3f   : > { %p823_p3 = pnand %p822_p0, %p821_p13  ;;  %p827_p9 = scmp.lt.u32.totalorder %s825_s23, %s820_s16 }
  0x40   : > { %p829_p1 = scmp.lt.u32.totalorder %s820_s16, %s1112_s15 }
  0x41   : > { %p824_p5 = pneg %p823_p3  ;;  %p828_p2 = por %p827_p9, %p826_p7 }
  0x43   : > { %p830_p4 = por %p829_p1, %p828_p2 }
  0x45   : > { %p831_p6 = pnand %p830_p4, %p824_p5 }
  0x47   : > { %834 = shalt.err (!%p831_p6)
}
  0x48   : > { %s835_s25 = scalar_lea.vmem %s1119_s19, 128  ;;  %s959_s2 = smov [#allocation3]  }
  0x49   : > { %p836_p8 = scmp.ne.s32.totalorder %s1119_s19, %s835_s25  ;;  %s840_s26 = sshll.u32 %s959_s2, 4  ;;  %s841_s26 = int_to_ptr.vmem [resolvable:$false] %s840_s26 }
  0x4a   : > { %s842_s29 = scalar_lea.vmem %s841_s26, 256  ;;  %p843_p3 = scmp.lt.s32.totalorder %s1119_s19, %s841_s26 }
  0x4b   : > { %p838_p10 = pnand %p836_p8, %p822_p0  ;;  %p844_p7 = scmp.lt.s32.totalorder %s842_s29, %s835_s25 }
  0x4d   : > { %p839_p13 = pneg %p838_p10  ;;  %p845_p9 = por %p844_p7, %p843_p3 }
  0x4f   : > { %p846_p2 = pnand %p845_p9, %p839_p13 }
  0x51   : > { %849 = shalt.err (!%p846_p2)
}
  0x52   : > { %734 = dma.hbm_to_vmem [thread:$0]  (!%p1115_p11), %s1112_s15, 128, %s1119_s19, %s278_s22  }
  0x53   : > { %s295_s12 = sand.u32 1, %s954_s30   ;;  %s299_s23 = scalar_lea.vmem [#allocation6], %s1107_s10 }
  0x54   : > { %s306_s20 = sshll.u32 %s299_s23, 4  ;;  %s296_s21 = scalar_lea.sflag [#allocation7], %s295_s12  ;;  %s307_s20 = int_to_ptr.vmem [resolvable:$true] %s306_s20 }
  0x55   : > { %s850_s16 = scalar_lea.hbm %s1124_s17, 128  ;;  %s855_s2 = scalar_lea.hbm %s1268_s1, 256 }
  0x56   : > { %p851_p5 = scmp.ne.s32.totalorder %s1124_s17, %s850_s16  ;;  %p856_p6 = scmp.lt.u32.totalorder %s1124_s17, %s1268_s1 }
  0x57   : > { %p857_p8 = scmp.lt.u32.totalorder %s855_s2, %s850_s16  ;;  %p859_p13 = scmp.lt.u32.totalorder %s850_s16, %s1124_s17 }
  0x58   : > { %p853_p1 = pnand %p851_p5, %p822_p0 }
  0x59   : > { %p858_p10 = por %p857_p8, %p856_p6 }
  0x5a   : > { %p854_p4 = pneg %p853_p1 }
  0x5b   : > { %p860_p3 = por %p859_p13, %p858_p10 }
  0x5d   : > { %p861_p7 = pnand %p860_p3, %p854_p4 }
  0x5f   : > { %864 = shalt.err (!%p861_p7)
}
  0x60   : > { %s865_s10 = scalar_lea.vmem %s307_s20, 128  ;;  %s960_s15 = smov [#allocation6]  }
  0x61   : > { %p866_p9 = scmp.ne.s32.totalorder %s307_s20, %s865_s10  ;;  %s870_s19 = sshll.u32 %s960_s15, 4  ;;  %s871_s19 = int_to_ptr.vmem [resolvable:$false] %s870_s19 }
  0x62   : > { %s872_s22 = scalar_lea.vmem %s871_s19, 256  ;;  %p873_p1 = scmp.lt.s32.totalorder %s307_s20, %s871_s19 }
  0x63   : > { %p868_p2 = pnand %p866_p9, %p822_p0  ;;  %p874_p12 = scmp.lt.s32.totalorder %s872_s22, %s865_s10 }
  0x65   : > { %p869_p5 = pneg %p868_p2  ;;  %p875_p6 = por %p874_p12, %p873_p1 }
  0x67   : > { %p876_p8 = pnand %p875_p6, %p869_p5 }
  0x69   : > { %879 = shalt.err (!%p876_p8)
}
  0x6a   : > { %737 = dma.hbm_to_vmem [thread:$0]  (!%p1115_p11), %s1124_s17, 128, %s307_s20, %s296_s21  }
  0x6b   : > { %p1297_p4 = scmp.ne.s32.totalorder %s1289_s13, 0 }
  0x6c   : > { %s1175_s12 = sand.u32 (!%p1297_p4), 1, %s946_s28   ;;  %p1298_p12 = scmp.ne.s32.totalorder (!%p1297_p4), %s1286_s11, 0 }
  0x6d   : > { %315 = sbr.rel (%p1297_p4) target bundleno = 874 (0x36a), region = 52  ;;  %s1178_s23 = sshll.u32 (!%p1297_p4), %s1175_s12, 3 }
  0x6e   : > { %s318_s16 = scalar_lea.sflag (!%p1297_p4), [#allocation4], %s1175_s12  ;;  %s321_s18 = scalar_lea.vmem (!%p1297_p4), [#allocation3], %s1178_s23 }
  0x74   : > { %925 = dma.done.wait (%p1298_p12), %s318_s16, 128  }
  0x75   : > { %927 = vsyncadd (%p1298_p12), %s318_s16, 4294967168  ;;  %s326_s13 = sand.u32 1, %s1031_s9   ;;  %s330_s17 = scalar_lea.vmem [#allocation6], %s1178_s23 }
  0x76   : > { %s327_s14 = scalar_lea.sflag [#allocation7], %s326_s13 }
  0x77   : > { %929 = dma.done.wait (%p1298_p12), %s327_s14, 128  }
  0x78   : > { %931 = vsyncadd (%p1298_p12), %s327_s14, 4294967168  ;;  %p1299_p11 = scmp.eq.s32.totalorder %s1031_s9, 0 }
  0x7a   : > { %933 = dma.done.wait (%p1299_p11), [#allocation7], 256   ;;  %p1300_p0 = pmov %p1299_p11 }
  0x7b   : > { %v961_v0 = vmov 0.0   ;;  %vm962_vm0 = vmmov 0   ;;  %vm374_vm1 = vcmask 130048   ;;  %v376_v1 = vld [vmem:[%s330_s17] sm:$0xff]  ;;  %v373_v2 = vld [vmem:[%s321_s18] sm:$0xff]  ;;  %s963_s20 = smov 16  }
  0x7c   : > { %935 = vsyncadd (%p1300_p0), [#allocation7], 4294967040  ;;  %701 = vmatprep.subr.bf16.mxu0 %v961_v0  ;;  %709 = vmatprep.subr.bf16.mxu1 %v961_v0  ;;  %375 = vst.msk [vmem:[#allocation2] sm:$0xff] %vm374_vm1, %v373_v2  ;;  %v784_v3 = vld [vmem:[#allocation8] sm:$0xff]   ;;  %v785_v4 = vld [vmem:[#allocation8 + $0x8] sm:$0xff]   ;;  %vm381_vm2 = vcmask 261248  }
  0x7d   : > { %705 = vmatprep.mubr.msk.bf16.mxu0 %vm962_vm0, %v961_v0  ;;  %713 = vmatprep.mubr.msk.bf16.mxu1 %vm962_vm0, %v961_v0  ;;  %vm408_vm3 = vcmask 261120   ;;  %v681_v8 = vld [vmem:[%s1270_s3] ss:$0 sm:$0xff]  ;;  %v787_v19 = vld [vmem:[%s1273_s6 + $0x8] sm:$0xff]   ;;  %s692_s13 = sshll.u32 %s1031_s9, 7  ;;  %s371_s14 = scalar_lea.vmem [#allocation9], %s1178_s23 }
  0x7e   : > { %378 = vrot.lane.b32.xlu0 %v376_v1, %s963_s20  ;;  %702 = vmatpush3.bf16.msra.mxu0 %v784_v3  ;;  %v786_v18 = vld [vmem:[%s1273_s6] sm:$0xff]   ;;  %s566_s17 = sshll.u32 %s371_s14, 4  ;;  %s1223_s21 = scalar_lea.hbm %s1275_s8, %s692_s13  ;;  %s1225_s17 = int_to_ptr.vmem [resolvable:$true] %s566_s17 }
  0x7f   : > { %703 = vmatprep.subr.bf16.mxu0 %v961_v0  ;;  %710 = vmatpush3.bf16.msra.mxu1 %v786_v18  ;;  %v685_v29 = vld [vmem:[%s1271_s4] ss:$0 sm:$0xff]  ;;  %s553_s25 = scalar_lea.sflag [#allocation5], %s1175_s12  ;;  %s880_s9 = scalar_lea.vmem %s1225_s17, 128 }
  0x80   : > { %711 = vmatprep.subr.bf16.mxu1 %v961_v0  ;;  %v686_v31 = vld [vmem:[%s1272_s5] ss:$0 sm:$0xff]  ;;  %p881_p10 = scmp.ne.s32.totalorder %s1225_s17, %s880_s9  ;;  %p1301_p13 = scmp.ne.s32.totalorder %s1295_s24, 0 }
  0x81   : > { %v687_v35 = vld [vmem:[%s1274_s7] ss:$0 sm:$0xff]  ;;  %s964_s23 = smov [#allocation9]  }
  0x82   : > { %704 = vmatpush3.bf16.msra.mxu0 %v785_v4  ;;  %p882_p3 = pnand %p881_p10, %p1301_p13  ;;  %s884_s2 = sshll.u32 %s964_s23, 4  ;;  %s885_s2 = int_to_ptr.vmem [resolvable:$false] %s884_s2 }
  0x83   : > { %712 = vmatpush3.bf16.msra.mxu1 %v787_v19  ;;  %s886_s26 = scalar_lea.vmem %s885_s2, 256  ;;  %p887_p9 = scmp.lt.s32.totalorder %s1225_s17, %s885_s2 }
  0x84   : > { %p883_p7 = pneg %p882_p3  ;;  %p888_p2 = scmp.lt.s32.totalorder %s886_s26, %s880_s9 }
  0x86   : > { %p889_p5 = por %p888_p2, %p887_p9 }
  0x88   : > { %p890_p1 = pnand %p889_p5, %p883_p7 }
  0xf0   : > { %v379_v5 = vpop.permute.xlu0 %378 }
  0xf1   : > { %382 = vst.msk [vmem:[#allocation2] sm:$0xff] %vm381_vm2, %v379_v5 }
  0xf8   : > { %v383_v6 = vld [vmem:[#allocation2] sm:$0xff] }
  0xf9   : > { %v384_v7 = vpack.c.bf16 %v383_v6, %v383_v6 }
  0xfb   : > { %706 = vmatmul.mubr.msk.bf16.vlgmr.msra.gmra.mrb[0].mxu0 %vm408_vm3, %v384_v7 }
 0x1ce   : > { %v446_v9 = vpop.f32.mrb[0].mxu0 }
 0x1cf   : > { %v447_v10 = vadd.f32 %v681_v8, %v446_v9  ;;  %v707_v11 = vpop.f32.mrb[1].mxu0 }
 0x1d0   : > { %v449_v12 = vpop.f32.mrb[2].mxu0 }
 0x1d1   : > { %788 = vtanh.f32 %v447_v10  ;;  %v708_v13 = vpop.f32.mrb[3].mxu0 }
 0x1db   : > { %v789_v14 = vpop.eup %788 }
 0x1dc   : > { %v453_v15 = vsel %vm408_vm3, %v789_v14, 0.0  ;;  %v457_v16 = vmul.f32 %v789_v14, %v789_v14 }
 0x1dd   : > { %454 = vadd.xlane.f32.xlu0 %v453_v15 }
 0x1de   : > { %v458_v17 = vsel %vm408_vm3, %v457_v16, 0.0 }
 0x1df   : > { %459 = vadd.xlane.f32.xlu1 %v458_v17 }
 0x26a   : > { %v455_v20 = vpop.xlane.xlu0 %454 }
 0x26b   : > { %v456_v21 = vmul.f32 0.03125, %v455_v20 }
 0x26c   : > { %v460_v22 = vpop.xlane.xlu1 %459 }
 0x26d   : > { %v462_v23 = vmul.f32 %v456_v21, %v456_v21  ;;  %v461_v24 = vmul.f32 0.03125, %v460_v22  ;;  %v464_v27 = vsub.f32 %v789_v14, %v456_v21 }
 0x26f   : > { %v463_v25 = vsub.f32 %v461_v24, %v462_v23 }
 0x271   : > { %v465_v26 = vadd.f32 1e-05, %v463_v25 }
 0x273   : > { %790 = vrsqrt.f32 %v465_v26 }
 0x27d   : > { %v791_v28 = vpop.eup %790 }
 0x27e   : > { %v467_v30 = vmul.f32 %v791_v28, %v464_v27 }
 0x280   : > { %v475_v32 = vmul.f32 %v685_v29, %v467_v30 }
 0x282   : > { %v483_v33 = vadd.f32 %v686_v31, %v475_v32 }
 0x284   : > { %v484_v34 = vpack.c.bf16 %v483_v33, %v483_v33 }
 0x286   : > { %714 = vmatmul.mubr.msk.bf16.vlgmr.msra.gmra.mrb[0].mxu1 %vm408_vm3, %v484_v34 }
 0x359   : > { %v545_v36 = vpop.f32.mrb[0].mxu1 }
 0x35a   : > { %v546_v37 = vadd.f32 %v687_v35, %v545_v36  ;;  %v715_v38 = vpop.f32.mrb[1].mxu1 }
 0x35b   : > { %v548_v39 = vpop.f32.mrb[2].mxu1 }
 0x35c   : > { %551 = vst [vmem:[%s371_s14] sm:$0xff] %v546_v37  ;;  %v716_v40 = vpop.f32.mrb[3].mxu1 }
 0x35d   : > { %893 = shalt.err (!%p890_p1)
}
 0x35e   : > { %s894_s12 = scalar_lea.hbm %s1223_s21, 128  ;;  %s898_s15 = scalar_lea.hbm %s1275_s8, 256 }
 0x35f   : > { %p895_p6 = scmp.ne.s32.totalorder %s1223_s21, %s894_s12  ;;  %p899_p12 = scmp.lt.u32.totalorder %s1223_s21, %s1275_s8 }
 0x360   : > { %p900_p11 = scmp.lt.u32.totalorder %s898_s15, %s894_s12  ;;  %p902_p10 = scmp.lt.u32.totalorder %s894_s12, %s1223_s21 }
 0x361   : > { %p896_p8 = pnand %p895_p6, %p1301_p13 }
 0x362   : > { %p901_p0 = por %p900_p11, %p899_p12 }
 0x363   : > { %p897_p4 = pneg %p896_p8 }
 0x364   : > { %p903_p3 = por %p902_p10, %p901_p0 }
 0x366   : > { %p904_p7 = pnand %p903_p3, %p897_p4 }
 0x368   : > { %907 = shalt.err (!%p904_p7)
}
 0x369   : > { %725 = dma.vmem_to_hbm [thread:$0]  (%p1301_p13), %s1225_s17, 128, %s1223_s21, %s553_s25  }
 0x36a PF: > { %s1302_s16 = sld [smem:[#allocation15_spill]]  ;;  %s578_s18 = sand.u32 1, %s942_s27  }
 0x36b   : > { %p1304_p2 = scmp.ge.s32.totalorder %s954_s30, 2  ;;  %s579_s13 = scalar_lea.sflag [#allocation5], %s578_s18 }
 0x370   : > { %p1303_p9 = scmp.ne.s32.totalorder %s1302_s16, 0 }
 0x372   : > { %p739_p5 = pnand %p1304_p2, %p1303_p9 }
 0x374   : > { %937 = dma.done.wait (!%p739_p5), %s579_s13, 128  }
 0x375   : > { %939 = vsyncadd (!%p739_p5), %s579_s13, 4294967168  ;;  %s1305_s30 = sld [smem:[#allocation16_spill]]  ;;  %s1306_s14 = sld [smem:[#allocation14_spill]] }
 0x376   : > { %s1307_s29 = sld [smem:[#allocation17_spill]]  ;;  %s1308_s27 = smov %s946_s28 }
 0x37b   : > { %p24_p1 = scmp.ge.s32.totalorder %s1305_s30, 4   ;;  %s1309_s28 = smov %s1306_s14 }
 0x37d   :  { %26 = sbr.rel (!%p24_p1) target bundleno = 9 (0x9), region = 114 }
 0x384   :  { %584 = vsyncpa [#allocation4], 1 }
 0x385   :  { %586 = vsyncpa [#allocation4 + $0x1], 1 }
 0x386   :  { %587 = vsyncpa [#allocation7], 1 }
 0x387   :  { %589 = vsyncpa [#allocation7 + $0x1], 1 }
 0x388   :  { %590 = vsyncpa [#allocation5], 1 }
 0x389   :  { %592 = vsyncpa [#allocation5 + $0x1], 1 }

</bundles_post_ra>
